<compile_context>
chip_gen: v7x
topology: tpu7x:2x2x1
jax: 0.10.0
libtpu: 0.0.40
codegen_flags: <defaults>
</compile_context>

<pallas_src>
import functools

import jax
import jax.numpy as jnp
from jax.experimental import pallas as pl
from jax.experimental.pallas import tpu as pltpu


def _round_up(x: int, m: int) -> int:
    return ((x + m - 1) // m) * m


def _pad_to(a, target_shape):
    pads = [(0, t - s) for s, t in zip(a.shape, target_shape)]
    return jnp.pad(a, pads)


def _mlp_tanh_kernel(x_ref, w1_ref, b1_ref, w2_ref, b2_ref, o_ref):
    # Layer 1: bf16 operands on the MXU, f32 accumulation; bias-add + tanh in f32
    # (tanh goes to the EUP, a separate bundle slot, so it overlaps with MXU work).
    h = jnp.tanh(
        jnp.dot(x_ref[...], w1_ref[...], preferred_element_type=jnp.float32)
        + b1_ref[...]
    )
    # Layer 2: cast activations back to bf16 for the MXU, accumulate in f32,
    # add bias and store the f32 result directly (no redundant astype).
    o_ref[...] = (
        jnp.dot(h.astype(w2_ref.dtype), w2_ref[...],
                preferred_element_type=jnp.float32)
        + b2_ref[...]
    )


@functools.partial(jax.jit, static_argnames=("tile_b",))
def net_tanh_forward(x, w1, b1, w2, b2, *, tile_b=512):
    """x: (B, D_in) f32; w1: (D_in, H); b1: (H,); w2: (H, D_out); b2: (D_out,)."""
    B, D_in = x.shape
    H = w1.shape[1]
    D_out = w2.shape[1]

    # Lane/sublane-friendly padded sizes.
    d_in_p = _round_up(D_in, 128)
    h_p = _round_up(H, 128)
    d_out_p = _round_up(D_out, 128)
    tb = min(tile_b, _round_up(B, 8))     # small batches: one sublane-aligned tile
    b_p = _round_up(B, tb)

    # Zero-pad + cast matmul operands to bf16 (biases stay f32 for the VPU/EUP).
    x_p = _pad_to(x, (b_p, d_in_p)).astype(jnp.bfloat16)
    w1_p = _pad_to(w1, (d_in_p, h_p)).astype(jnp.bfloat16)
    b1_p = _pad_to(b1.reshape(1, H), (1, h_p)).astype(jnp.float32)
    w2_p = _pad_to(w2, (h_p, d_out_p)).astype(jnp.bfloat16)
    b2_p = _pad_to(b2.reshape(1, D_out), (1, d_out_p)).astype(jnp.float32)

    grid = (b_p // tb,)

    flops = 2 * b_p * (d_in_p * h_p + h_p * d_out_p)
    bytes_accessed = (
        x_p.size * 2 + w1_p.size * 2 + w2_p.size * 2
        + b1_p.size * 4 + b2_p.size * 4 + b_p * d_out_p * 4
    )
    cost = pl.CostEstimate(
        flops=flops, transcendentals=b_p * h_p, bytes_accessed=bytes_accessed
    )

    out_p = pl.pallas_call(
        _mlp_tanh_kernel,
        out_shape=jax.ShapeDtypeStruct((b_p, d_out_p), jnp.float32),
        grid_spec=pltpu.PrefetchScalarGridSpec(
            num_scalar_prefetch=0,
            grid=grid,
            in_specs=[
                pl.BlockSpec((tb, d_in_p), lambda i: (i, 0)),     # batch-tiled x
                pl.BlockSpec((d_in_p, h_p), lambda i: (0, 0)),    # resident W1
                pl.BlockSpec((1, h_p), lambda i: (0, 0)),         # resident b1
                pl.BlockSpec((h_p, d_out_p), lambda i: (0, 0)),   # resident W2
                pl.BlockSpec((1, d_out_p), lambda i: (0, 0)),     # resident b2
            ],
            out_specs=pl.BlockSpec((tb, d_out_p), lambda i: (i, 0)),
        ),
        compiler_params=pltpu.CompilerParams(
            dimension_semantics=("parallel",),        # shard batch over v7x's 2 TCs
            vmem_limit_bytes=32 * 1024 * 1024,        # safe on v5e/v6e/v7x
        ),
        cost_estimate=cost,
    )(x_p, w1_p, b1_p, w2_p, b2_p)

    # Strip padding.
    return out_p[:B, :D_out]


def init_params(key, d_in, h, d_out):
    """Deterministic init mirroring nn.Linear's U(-1/sqrt(fan_in), 1/sqrt(fan_in))."""
    k1, k2, k3, k4 = jax.random.split(key, 4)
    bound1 = 1.0 / jnp.sqrt(d_in)
    bound2 = 1.0 / jnp.sqrt(h)
    # Stored already transposed: (D_in, H) and (H, D_out).
    w1 = jax.random.uniform(k1, (d_in, h), jnp.float32, -bound1, bound1)
    b1 = jax.random.uniform(k2, (h,), jnp.float32, -bound1, bound1)
    w2 = jax.random.uniform(k3, (h, d_out), jnp.float32, -bound2, bound2)
    b2 = jax.random.uniform(k4, (d_out,), jnp.float32, -bound2, bound2)
    return w1, b1, w2, b2


if __name__ == "__main__":
    # Small MNIST-like shapes: batch=8, D_in=64 (e.g. 8x8 flattened), H=32, D_out=10.
    B, D_in, H, D_out = 8, 64, 32, 10

    key = jax.random.PRNGKey(0)
    kx, kp = jax.random.split(key)
    x = jax.random.normal(kx, (B, D_in), jnp.float32)
    w1, b1, w2, b2 = init_params(kp, D_in, H, D_out)

    out = net_tanh_forward(x, w1, b1, w2, b2)
    out = jax.block_until_ready(out)

    # Cross-check against pure-JAX f32 reference (bf16 matmul operands => loosen tol).
    ref = jnp.tanh(x @ w1 + b1) @ w2 + b2
    assert out.shape == (B, D_out)
    assert jnp.allclose(out, ref, atol=5e-2, rtol=5e-2), float(
        jnp.max(jnp.abs(out - ref))
    )

    print("KERNEL_OK")
</pallas_src>

<mosaic_0001>
module attributes {stable_mosaic.version = 11 : i64} {
  func.func @_mlp_tanh_kernel(%arg0: i32, %arg1: memref<8x128xbf16, #tpu.memory_space<vmem>>, %arg2: memref<128x128xbf16, #tpu.memory_space<vmem>>, %arg3: memref<1x128xf32, #tpu.memory_space<vmem>>, %arg4: memref<128x128xbf16, #tpu.memory_space<vmem>>, %arg5: memref<1x128xf32, #tpu.memory_space<vmem>>, %arg6: memref<8x128xf32, #tpu.memory_space<vmem>>) attributes {dimension_semantics = [#tpu.dimension_semantics<parallel>], iteration_bounds = array<i64: 1>, scalar_prefetch = 0 : i64, scratch_operands = 0 : i64, tpu.core_type = #tpu.core_type<tc>, window_params = [{transform_indices = @transform_0, window_bounds = array<i64: 8, 128>}, {pipeline_mode = #tpu.pipeline_mode<synchronous>, transform_indices = @transform_1, window_bounds = array<i64: 128, 128>}, {pipeline_mode = #tpu.pipeline_mode<synchronous>, transform_indices = @transform_2, window_bounds = array<i64: 1, 128>}, {pipeline_mode = #tpu.pipeline_mode<synchronous>, transform_indices = @transform_3, window_bounds = array<i64: 128, 128>}, {pipeline_mode = #tpu.pipeline_mode<synchronous>, transform_indices = @transform_4, window_bounds = array<i64: 1, 128>}, {transform_indices = @transform_5, window_bounds = array<i64: 8, 128>}]} {
    %c0 = arith.constant 0 : index
    %c0_0 = arith.constant 0 : index
    %0 = vector.load %arg1[%c0, %c0_0] : memref<8x128xbf16, #tpu.memory_space<vmem>>, vector<8x128xbf16>
    %c0_1 = arith.constant 0 : index
    %c0_2 = arith.constant 0 : index
    %1 = vector.load %arg2[%c0_1, %c0_2] : memref<128x128xbf16, #tpu.memory_space<vmem>>, vector<128x128xbf16>
    %cst = arith.constant dense<0.000000e+00> : vector<8x128xf32>
    %2 = tpu.matmul %0, %1, %cst {dimension_numbers = #tpu.dot_dimension_numbers<[1], [0], [0], [1], [0, 0, 1, 1], [], []>} : vector<8x128xbf16>, vector<128x128xbf16>, vector<8x128xf32> -> vector<8x128xf32>
    %c0_3 = arith.constant 0 : index
    %c0_4 = arith.constant 0 : index
    %3 = vector.load %arg3[%c0_3, %c0_4] : memref<1x128xf32, #tpu.memory_space<vmem>>, vector<1x128xf32>
    %4 = vector.broadcast %3 : vector<1x128xf32> to vector<8x128xf32>
    %5 = arith.addf %2, %4 : vector<8x128xf32>
    %6 = math.tanh %5 : vector<8x128xf32>
    %7 = arith.truncf %6 : vector<8x128xf32> to vector<8x128xbf16>
    %c0_5 = arith.constant 0 : index
    %c0_6 = arith.constant 0 : index
    %8 = vector.load %arg4[%c0_5, %c0_6] : memref<128x128xbf16, #tpu.memory_space<vmem>>, vector<128x128xbf16>
    %cst_7 = arith.constant dense<0.000000e+00> : vector<8x128xf32>
    %9 = tpu.matmul %7, %8, %cst_7 {dimension_numbers = #tpu.dot_dimension_numbers<[1], [0], [0], [1], [0, 0, 1, 1], [], []>} : vector<8x128xbf16>, vector<128x128xbf16>, vector<8x128xf32> -> vector<8x128xf32>
    %c0_8 = arith.constant 0 : index
    %c0_9 = arith.constant 0 : index
    %10 = vector.load %arg5[%c0_8, %c0_9] : memref<1x128xf32, #tpu.memory_space<vmem>>, vector<1x128xf32>
    %11 = vector.broadcast %10 : vector<1x128xf32> to vector<8x128xf32>
    %12 = arith.addf %9, %11 : vector<8x128xf32>
    %c0_10 = arith.constant 0 : index
    %c0_11 = arith.constant 0 : index
    %13 = vector.load %arg6[%c0_10, %c0_11] : memref<8x128xf32, #tpu.memory_space<vmem>>, vector<8x128xf32>
    tpu.vector_store %arg6[%c0_10, %c0_11], %12 {strides = array<i32>} : memref<8x128xf32, #tpu.memory_space<vmem>>, vector<8x128xf32>,
    return
  }
  func.func @transform_0(%arg0: i32) -> (i32, i32) {
    %c0_i32 = arith.constant 0 : i32
    %c0_i32_0 = arith.constant 0 : i32
    return %arg0, %c0_i32 : i32, i32
  }
  func.func @transform_1(%arg0: i32) -> (i32, i32) {
    %c0_i32 = arith.constant 0 : i32
    %c0_i32_0 = arith.constant 0 : i32
    %c0_i32_1 = arith.constant 0 : i32
    return %c0_i32, %c0_i32_0 : i32, i32
  }
  func.func @transform_2(%arg0: i32) -> (i32, i32) {
    %c0_i32 = arith.constant 0 : i32
    %c0_i32_0 = arith.constant 0 : i32
    %c0_i32_1 = arith.constant 0 : i32
    return %c0_i32, %c0_i32_0 : i32, i32
  }
  func.func @transform_3(%arg0: i32) -> (i32, i32) {
    %c0_i32 = arith.constant 0 : i32
    %c0_i32_0 = arith.constant 0 : i32
    %c0_i32_1 = arith.constant 0 : i32
    return %c0_i32, %c0_i32_0 : i32, i32
  }
  func.func @transform_4(%arg0: i32) -> (i32, i32) {
    %c0_i32 = arith.constant 0 : i32
    %c0_i32_0 = arith.constant 0 : i32
    %c0_i32_1 = arith.constant 0 : i32
    return %c0_i32, %c0_i32_0 : i32, i32
  }
  func.func @transform_5(%arg0: i32) -> (i32, i32) {
    %c0_i32 = arith.constant 0 : i32
    %c0_i32_0 = arith.constant 0 : i32
    return %arg0, %c0_i32 : i32, i32
  }
}

</mosaic_0001>

<bundles_post_ra>
// kernel: net_tanh_forward.1
= control target key start
LH: loop header
LB: loop body
LE: loop exit
PB: predicated region body
PF: predicated region fallthrough
CT: control target
= control target key end

     0   :  { %v383_v1 = vmov 0.0   ;;  %vm384_vm0 = vmmov 0   ;;  %s485_s0 = inlined_call_operand.vmem [shape: bf16[8,128], index: 0, kind: input, shape index: {}]   ;;  %s486_s1 = inlined_call_operand.vmem [shape: bf16[128,128], index: 1, kind: input, shape index: {}]   ;;  %s487_s2 = inlined_call_operand.vmem [shape: f32[1,128], index: 2, kind: input, shape index: {}]   ;;  %s488_s3 = inlined_call_operand.vmem [shape: bf16[128,128], index: 3, kind: input, shape index: {}]   ;;  %s489_s4 = inlined_call_operand.vmem [shape: f32[1,128], index: 4, kind: input, shape index: {}]   ;;  %s490_s5 = inlined_call_operand.hbm [shape: f32[8,128], index: 5, kind: output, shape index: {}]  }
   0x1   :  { %v341_v0 = vld [vmem:[%s486_s1] sm:$0xff]   ;;  %298 = vmatprep.subr.bf16.mxu0 %v383_v1  ;;  %318 = vmatprep.subr.bf16.mxu1 %v383_v1  ;;  %v342_v2 = vld [vmem:[%s486_s1 + $0x8] sm:$0xff]   ;;  %v343_v3 = vld [vmem:[%s486_s1 + $0x10] sm:$0xff]  }
   0x2   :  { %299 = vmatpush3.bf16.msra.mxu0 %v341_v0  ;;  %314 = vmatprep.mubr.msk.bf16.mxu0 %vm384_vm0, %v383_v1  ;;  %v349_v4 = vld [vmem:[%s488_s3] sm:$0xff]   ;;  %v344_v5 = vld [vmem:[%s486_s1 + $0x18] sm:$0xff]   ;;  %v350_v6 = vld [vmem:[%s488_s3 + $0x8] sm:$0xff]  }
   0x3   :  { %300 = vmatprep.subr.bf16.mxu0 %v383_v1  ;;  %334 = vmatprep.mubr.msk.bf16.mxu1 %vm384_vm0, %v383_v1  ;;  %v345_v7 = vld [vmem:[%s486_s1 + $0x20] sm:$0xff]   ;;  %v351_v8 = vld [vmem:[%s488_s3 + $0x10] sm:$0xff]  }
   0x4   :  { %319 = vmatpush3.bf16.msra.mxu1 %v349_v4 }
   0x5   :  { %320 = vmatprep.subr.bf16.mxu1 %v383_v1 }
   0x6   :  { %301 = vmatpush3.bf16.msra.mxu0 %v342_v2 }
   0x7   :  { %302 = vmatprep.subr.bf16.mxu0 %v383_v1 }
   0x8   :  { %321 = vmatpush3.bf16.msra.mxu1 %v350_v6 }
   0xa   :  { %303 = vmatpush3.bf16.msra.mxu0 %v343_v3 }
   0xb   :  { %304 = vmatprep.subr.bf16.mxu0 %v383_v1 }
   0xe   :  { %305 = vmatpush3.bf16.msra.mxu0 %v344_v5 }
   0xf   :  { %306 = vmatprep.subr.bf16.mxu0 %v383_v1 }
  0x10   :  { %10 = vsyncpa [#allocation3], 0  ;;  %322 = vmatprep.subr.bf16.mxu1 %v383_v1  ;;  %v346_v9 = vld [vmem:[%s486_s1 + $0x28] sm:$0xff]   ;;  %v352_v10 = vld [vmem:[%s488_s3 + $0x18] sm:$0xff]   ;;  %s385_s29 = smov [#allocation2]  }
  0x11   :  { %323 = vmatpush3.bf16.msra.mxu1 %v351_v8  ;;  %v347_v11 = vld [vmem:[%s486_s1 + $0x30] sm:$0xff]   ;;  %v348_v12 = vld [vmem:[%s486_s1 + $0x38] sm:$0xff]   ;;  %v22_v13 = vld [vmem:[%s485_s0] sm:$0xf] }
  0x12   :  { %307 = vmatpush3.bf16.msra.mxu0 %v345_v7  ;;  %324 = vmatprep.subr.bf16.mxu1 %v383_v1  ;;  %v353_v14 = vld [vmem:[%s488_s3 + $0x20] sm:$0xff]   ;;  %v354_v15 = vld [vmem:[%s488_s3 + $0x28] sm:$0xff]   ;;  %v355_v16 = vld [vmem:[%s488_s3 + $0x30] sm:$0xff]  }
  0x13   :  { %308 = vmatprep.subr.bf16.mxu0 %v383_v1  ;;  %v356_v17 = vld [vmem:[%s488_s3 + $0x38] sm:$0xff]   ;;  %v262_v18 = vld [vmem:[%s487_s2] ss:$0 sm:$0xff]  ;;  %s254_s3 = sshll.u32 %s385_s29, 4  ;;  %s255_s3 = int_to_ptr.vmem [resolvable:$true] %s254_s3 }
  0x14   :  { %v271_v26 = vld [vmem:[%s489_s4] ss:$0 sm:$0xff]  ;;  %s359_s2 = scalar_lea.vmem %s255_s3, 128  ;;  %p364_p1 = scmp.lt.s32.totalorder %s255_s3, %s255_s3 }
  0x15   :  { %325 = vmatpush3.bf16.msra.mxu1 %v352_v10  ;;  %p360_p0 = scmp.ne.s32.totalorder %s255_s3, %s359_s2  ;;  %p365_p2 = scmp.lt.s32.totalorder %s359_s2, %s359_s2 }
  0x16   :  { %309 = vmatpush3.bf16.msra.mxu0 %v346_v9  ;;  %326 = vmatprep.subr.bf16.mxu1 %v383_v1 }
  0x17   :  { %310 = vmatprep.subr.bf16.mxu0 %v383_v1  ;;  %p366_p3 = por %p365_p2, %p364_p1 }
  0x19   :  { %327 = vmatpush3.bf16.msra.mxu1 %v353_v14  ;;  %p367_p4 = pnand %p366_p3, %p360_p0 }
  0x1a   :  { %311 = vmatpush3.bf16.msra.mxu0 %v347_v11  ;;  %328 = vmatprep.subr.bf16.mxu1 %v383_v1 }
  0x1b   :  { %312 = vmatprep.subr.bf16.mxu0 %v383_v1 }
  0x1d   :  { %329 = vmatpush3.bf16.msra.mxu1 %v354_v15 }
  0x1e   :  { %313 = vmatpush3.bf16.msra.mxu0 %v348_v12  ;;  %330 = vmatprep.subr.bf16.mxu1 %v383_v1 }
  0x21   :  { %315 = vmatmul.mubr.bf16.vlgmr.msra.gmra.mrb[0].mxu0 %v22_v13  ;;  %331 = vmatpush3.bf16.msra.mxu1 %v355_v16 }
  0x22   :  { %332 = vmatprep.subr.bf16.mxu1 %v383_v1 }
  0x25   :  { %333 = vmatpush3.bf16.msra.mxu1 %v356_v17 }
  0xf4   :  { %v128_v19 = vpop.f32.mrb[0].mxu0 }
  0xf5   :  { %v129_v20 = vadd.f32 %v262_v18, %v128_v19  ;;  %v316_v21 = vpop.f32.mrb[1].mxu0 }
  0xf6   :  { %v131_v22 = vpop.f32.mrb[2].mxu0 }
  0xf7   :  { %357 = vtanh.f32 %v129_v20  ;;  %v317_v23 = vpop.f32.mrb[3].mxu0 }
 0x101   :  { %v358_v24 = vpop.eup %357 }
 0x102   :  { %v135_v25 = vpack.c.bf16 %v358_v24, %v358_v24 }
 0x104   :  { %335 = vmatmul.mubr.bf16.vlgmr.msra.gmra.mrb[0].mxu1 %v135_v25 }
 0x1d7   :  { %v241_v27 = vpop.f32.mrb[0].mxu1 }
 0x1d8   :  { %v242_v28 = vadd.f32 %v271_v26, %v241_v27  ;;  %v336_v29 = vpop.f32.mrb[1].mxu1 }
 0x1d9   :  { %v244_v30 = vpop.f32.mrb[2].mxu1 }
 0x1da   :  { %247 = vst [vmem:[#allocation2] sm:$0xff] %v242_v28  ;;  %v337_v31 = vpop.f32.mrb[3].mxu1 }
 0x1db   :  { %370 = shalt.err (!%p367_p4)
}
 0x1dc   :  { %s371_s4 = scalar_lea.hbm %s490_s5, 128 }
 0x1dd   :  { %p372_p5 = scmp.ne.s32.totalorder %s490_s5, %s371_s4  ;;  %p375_p6 = scmp.lt.u32.totalorder %s371_s4, %s490_s5 }
 0x1df   :  { %p377_p7 = pnand %p375_p6, %p372_p5 }
 0x1e1   :  { %380 = shalt.err (!%p377_p7)
}
 0x1e2   :  { %257 = dma.vmem_to_hbm [thread:$0]  %s255_s3, 128, %s490_s5, [#allocation3]  }
 0x1e3   :  { %381 = dma.done.wait [#allocation3], 128  }
 0x1e4   :  { %382 = vsyncadd [#allocation3], 4294967168 }
 0x1e5   :  { %261 = vsyncpa [#allocation3], 1 }

</bundles_post_ra>
